<compile_context>
chip_gen: v6e
topology: v6e:2x2x1
jax: 0.10.0
libtpu: 0.0.40
codegen_flags: <defaults>
</compile_context>

<pallas_src>
import functools

import jax
import jax.numpy as jnp
from jax.experimental import pallas as pl
from jax.experimental.pallas import tpu as pltpu


def _round_up(x, m):
    return ((x + m - 1) // m) * m


def _head_kernel(x_ref, w1_ref, b1_ref, w2_ref, b2_ref, o_ref):
    # dropout is identity at inference time (no-op here)
    # dense: (TB, Hp) @ (Hp, Hp) on the MXU, f32 accumulation
    h = jnp.dot(x_ref[...], w1_ref[...], preferred_element_type=jnp.float32)
    h = jnp.tanh(h + b1_ref[...])  # f32 elementwise (EUP); v5e-safe
    # out_proj: (TB, Hp) @ (Hp, Lp); feed the MXU in the weight dtype (bf16 fast path)
    out = jnp.dot(h.astype(w2_ref.dtype), w2_ref[...],
                  preferred_element_type=jnp.float32) + b2_ref[...]
    o_ref[...] = out.astype(o_ref.dtype)


def prepare_head_params(w_dense, b_dense, w_out, b_out, param_dtype=None):
    """One-time packing of head parameters (do NOT call per inference step).

    Args (PyTorch nn.Linear layout):
      w_dense: (H, H)  dense.weight     (out_features, in_features)
      b_dense: (H,)    dense.bias
      w_out:   (L, H)  out_proj.weight
      b_out:   (L,)    out_proj.bias
    Returns (w1, b1, w2, b2): (in, out)-layout weights zero-padded to 128-lane
    multiples (padding is mathematically exact), biases in f32.
    """
    H = w_dense.shape[1]
    L = w_out.shape[0]
    Hp = _round_up(H, 128)
    Lp = _round_up(L, 128)
    dt = param_dtype if param_dtype is not None else jnp.asarray(w_dense).dtype
    w1 = jnp.zeros((Hp, Hp), dt).at[:H, :H].set(jnp.asarray(w_dense).T.astype(dt))
    b1 = jnp.zeros((1, Hp), jnp.float32).at[0, :H].set(
        jnp.asarray(b_dense).astype(jnp.float32))
    w2 = jnp.zeros((Hp, Lp), dt).at[:H, :L].set(jnp.asarray(w_out).T.astype(dt))
    b2 = jnp.zeros((1, Lp), jnp.float32).at[0, :L].set(
        jnp.asarray(b_out).astype(jnp.float32))
    return w1, b1, w2, b2


@functools.partial(jax.jit, static_argnames=("num_labels", "block_b"))
def wav2vec2_classification_head(features, w1, b1, w2, b2, *, num_labels,
                                 block_b=128):
    """features: (B, H); (w1, b1, w2, b2) from prepare_head_params().

    Returns logits of shape (B, num_labels) in features.dtype.
    """
    B, H = features.shape
    Hp = w1.shape[0]
    Lp = w2.shape[1]

    # Batch tile: multiple of 8 sublanes, capped at block_b (MXU-sized for big B).
    TB = min(block_b, _round_up(max(B, 1), 8))
    Bp = _round_up(B, TB)

    x = features
    if (Bp, Hp) != (B, H):
        x = jnp.zeros((Bp, Hp), features.dtype).at[:B, :H].set(features)

    bytes_accessed = int(
        Bp * Hp * x.dtype.itemsize
        + w1.size * w1.dtype.itemsize + b1.size * b1.dtype.itemsize
        + w2.size * w2.dtype.itemsize + b2.size * b2.dtype.itemsize
        + Bp * Lp * features.dtype.itemsize)
    cost = pl.CostEstimate(
        flops=2 * Bp * Hp * Hp + 2 * Bp * Hp * Lp,
        transcendentals=Bp * Hp,
        bytes_accessed=bytes_accessed,
    )

    out = pl.pallas_call(
        _head_kernel,
        out_shape=jax.ShapeDtypeStruct((Bp, Lp), features.dtype),
        grid=(Bp // TB,),
        in_specs=[
            pl.BlockSpec((TB, Hp), lambda i: (i, 0)),   # x tile (pipelined)
            pl.BlockSpec((Hp, Hp), lambda i: (0, 0)),   # W1 resident in VMEM
            pl.BlockSpec((1, Hp), lambda i: (0, 0)),    # b1 resident (f32)
            pl.BlockSpec((Hp, Lp), lambda i: (0, 0)),   # W2 resident in VMEM
            pl.BlockSpec((1, Lp), lambda i: (0, 0)),    # b2 resident (f32)
        ],
        out_specs=pl.BlockSpec((TB, Lp), lambda i: (i, 0)),  # lane-dense store
        compiler_params=pltpu.CompilerParams(
            dimension_semantics=("parallel",),  # shard batch grid across v7x TCs
        ),
        cost_estimate=cost,
    )(x, w1, b1, w2, b2)

    return out[:B, :num_labels]


if __name__ == "__main__":
    # Small synthetic config: hidden_size=32, num_labels=4, batch=2
    B, H, L = 2, 32, 4

    key = jax.random.PRNGKey(0)
    k_x, k_w1, k_b1, k_w2, k_b2 = jax.random.split(key, 5)

    features = jax.random.normal(k_x, (B, H), dtype=jnp.float32)
    # PyTorch nn.Linear layout: weight is (out_features, in_features)
    w_dense = jax.random.normal(k_w1, (H, H), dtype=jnp.float32) * 0.05
    b_dense = jax.random.normal(k_b1, (H,), dtype=jnp.float32) * 0.01
    w_out = jax.random.normal(k_w2, (L, H), dtype=jnp.float32) * 0.05
    b_out = jax.random.normal(k_b2, (L,), dtype=jnp.float32) * 0.01

    # Plain-JAX reference (same math, f32)
    ref = jnp.tanh(features @ w_dense.T + b_dense) @ w_out.T + b_out

    # f32 path: tight-tolerance correctness check
    params_f32 = prepare_head_params(w_dense, b_dense, w_out, b_out)
    out_f32 = wav2vec2_classification_head(features, *params_f32, num_labels=L)
    out_f32 = jax.block_until_ready(out_f32)
    assert out_f32.shape == (B, L)
    assert jnp.allclose(out_f32, ref, atol=1e-5, rtol=1e-5), "f32 mismatch vs reference"

    # bf16 fast path (bf16 operands into the MXU, f32 accumulation): loose check
    params_bf16 = prepare_head_params(w_dense, b_dense, w_out, b_out,
                                      param_dtype=jnp.bfloat16)
    out_bf16 = wav2vec2_classification_head(features.astype(jnp.bfloat16),
                                            *params_bf16, num_labels=L)
    out_bf16 = jax.block_until_ready(out_bf16)
    assert out_bf16.shape == (B, L)
    assert jnp.allclose(out_bf16.astype(jnp.float32), ref, atol=5e-2, rtol=5e-2), \
        "bf16 mismatch vs reference"

    # TODO(synk): training-mode dropout is not implemented (eval-mode identity only).
    print("KERNEL_OK")
</pallas_src>

<mosaic_0001>
module attributes {stable_mosaic.version = 11 : i64} {
  func.func @_head_kernel(%arg0: i32, %arg1: memref<8x128xf32, #tpu.memory_space<vmem>>, %arg2: memref<128x128xf32, #tpu.memory_space<vmem>>, %arg3: memref<1x128xf32, #tpu.memory_space<vmem>>, %arg4: memref<128x128xf32, #tpu.memory_space<vmem>>, %arg5: memref<1x128xf32, #tpu.memory_space<vmem>>, %arg6: memref<8x128xf32, #tpu.memory_space<vmem>>) attributes {dimension_semantics = [#tpu.dimension_semantics<parallel>], iteration_bounds = array<i64: 1>, scalar_prefetch = 0 : i64, scratch_operands = 0 : i64, tpu.core_type = #tpu.core_type<tc>, window_params = [{transform_indices = @transform_0, window_bounds = array<i64: 8, 128>}, {pipeline_mode = #tpu.pipeline_mode<synchronous>, transform_indices = @transform_1, window_bounds = array<i64: 128, 128>}, {pipeline_mode = #tpu.pipeline_mode<synchronous>, transform_indices = @transform_2, window_bounds = array<i64: 1, 128>}, {pipeline_mode = #tpu.pipeline_mode<synchronous>, transform_indices = @transform_3, window_bounds = array<i64: 128, 128>}, {pipeline_mode = #tpu.pipeline_mode<synchronous>, transform_indices = @transform_4, window_bounds = array<i64: 1, 128>}, {transform_indices = @transform_5, window_bounds = array<i64: 8, 128>}]} {
    %c0 = arith.constant 0 : index
    %c0_0 = arith.constant 0 : index
    %0 = vector.load %arg1[%c0, %c0_0] : memref<8x128xf32, #tpu.memory_space<vmem>>, vector<8x128xf32>
    %c0_1 = arith.constant 0 : index
    %c0_2 = arith.constant 0 : index
    %1 = vector.load %arg2[%c0_1, %c0_2] : memref<128x128xf32, #tpu.memory_space<vmem>>, vector<128x128xf32>
    %cst = arith.constant dense<0.000000e+00> : vector<8x128xf32>
    %2 = tpu.matmul %0, %1, %cst {dimension_numbers = #tpu.dot_dimension_numbers<[1], [0], [0], [1], [0, 0, 1, 1], [], []>} : vector<8x128xf32>, vector<128x128xf32>, vector<8x128xf32> -> vector<8x128xf32>
    %c0_3 = arith.constant 0 : index
    %c0_4 = arith.constant 0 : index
    %3 = vector.load %arg3[%c0_3, %c0_4] : memref<1x128xf32, #tpu.memory_space<vmem>>, vector<1x128xf32>
    %4 = vector.broadcast %3 : vector<1x128xf32> to vector<8x128xf32>
    %5 = arith.addf %2, %4 : vector<8x128xf32>
    %6 = math.tanh %5 : vector<8x128xf32>
    %c0_5 = arith.constant 0 : index
    %c0_6 = arith.constant 0 : index
    %7 = vector.load %arg4[%c0_5, %c0_6] : memref<128x128xf32, #tpu.memory_space<vmem>>, vector<128x128xf32>
    %cst_7 = arith.constant dense<0.000000e+00> : vector<8x128xf32>
    %8 = tpu.matmul %6, %7, %cst_7 {dimension_numbers = #tpu.dot_dimension_numbers<[1], [0], [0], [1], [0, 0, 1, 1], [], []>} : vector<8x128xf32>, vector<128x128xf32>, vector<8x128xf32> -> vector<8x128xf32>
    %c0_8 = arith.constant 0 : index
    %c0_9 = arith.constant 0 : index
    %9 = vector.load %arg5[%c0_8, %c0_9] : memref<1x128xf32, #tpu.memory_space<vmem>>, vector<1x128xf32>
    %10 = vector.broadcast %9 : vector<1x128xf32> to vector<8x128xf32>
    %11 = arith.addf %8, %10 : vector<8x128xf32>
    %c0_10 = arith.constant 0 : index
    %c0_11 = arith.constant 0 : index
    %12 = vector.load %arg6[%c0_10, %c0_11] : memref<8x128xf32, #tpu.memory_space<vmem>>, vector<8x128xf32>
    tpu.vector_store %arg6[%c0_10, %c0_11], %11 {strides = array<i32>} : memref<8x128xf32, #tpu.memory_space<vmem>>, vector<8x128xf32>,
    return
  }
  func.func @transform_0(%arg0: i32) -> (i32, i32) {
    %c0_i32 = arith.constant 0 : i32
    %c0_i32_0 = arith.constant 0 : i32
    return %arg0, %c0_i32 : i32, i32
  }
  func.func @transform_1(%arg0: i32) -> (i32, i32) {
    %c0_i32 = arith.constant 0 : i32
    %c0_i32_0 = arith.constant 0 : i32
    %c0_i32_1 = arith.constant 0 : i32
    return %c0_i32, %c0_i32_0 : i32, i32
  }
  func.func @transform_2(%arg0: i32) -> (i32, i32) {
    %c0_i32 = arith.constant 0 : i32
    %c0_i32_0 = arith.constant 0 : i32
    %c0_i32_1 = arith.constant 0 : i32
    return %c0_i32, %c0_i32_0 : i32, i32
  }
  func.func @transform_3(%arg0: i32) -> (i32, i32) {
    %c0_i32 = arith.constant 0 : i32
    %c0_i32_0 = arith.constant 0 : i32
    %c0_i32_1 = arith.constant 0 : i32
    return %c0_i32, %c0_i32_0 : i32, i32
  }
  func.func @transform_4(%arg0: i32) -> (i32, i32) {
    %c0_i32 = arith.constant 0 : i32
    %c0_i32_0 = arith.constant 0 : i32
    %c0_i32_1 = arith.constant 0 : i32
    return %c0_i32, %c0_i32_0 : i32, i32
  }
  func.func @transform_5(%arg0: i32) -> (i32, i32) {
    %c0_i32 = arith.constant 0 : i32
    %c0_i32_0 = arith.constant 0 : i32
    return %arg0, %c0_i32 : i32, i32
  }
}

</mosaic_0001>

<bundles_post_ra>
// kernel: wav2vec2_classification_head.1
= control target key start
LH: loop header
LB: loop body
LE: loop exit
PB: predicated region body
PF: predicated region fallthrough
CT: control target
= control target key end

     0   :  { %10 = vsyncpa [#allocation3], 0  ;;  %s489_s0 = inlined_call_operand.vmem [shape: f32[8,128], index: 0, kind: input, shape index: {}]   ;;  %s490_s1 = inlined_call_operand.hbm [shape: f32[128,128], index: 1, kind: input, shape index: {}]   ;;  %s491_s2 = inlined_call_operand.vmem [shape: f32[1,128], index: 2, kind: input, shape index: {}]   ;;  %s492_s3 = inlined_call_operand.hbm [shape: f32[128,128], index: 3, kind: input, shape index: {}]   ;;  %s493_s4 = inlined_call_operand.vmem [shape: f32[1,128], index: 4, kind: input, shape index: {}]   ;;  %s494_s5 = inlined_call_operand.vmem [shape: f32[8,128], index: 5, kind: output, shape index: {}]  }
   0x1   :  { %11 = vsyncpa [#allocation5], 0  ;;  %s401_s18 = smov [#allocation2]  }
   0x2   :  { %s19_s19 = sshll.u32 %s401_s18, 4  ;;  %s20_s19 = int_to_ptr.vmem [resolvable:$true] %s19_s19 }
   0x3   :  { %s365_s20 = scalar_lea.vmem %s20_s19, 2048  ;;  %p370_p1 = scmp.lt.s32.totalorder %s20_s19, %s20_s19 }
   0x4   :  { %p366_p0 = scmp.ne.s32.totalorder %s20_s19, %s365_s20  ;;  %p371_p2 = scmp.lt.s32.totalorder %s365_s20, %s365_s20 }
   0x6   :  { %p372_p3 = por %p371_p2, %p370_p1 }
   0x8   :  { %p373_p4 = pnand %p372_p3, %p366_p0 }
   0xa   :  { %376 = shalt.err (!%p373_p4)
}
   0xb   :  { %s402_s21 = smov 128   ;;  %s403_s22 = smov 8  }
   0xc   :  { %25 = dma.hbm_to_vmem [thread:$0]  %s490_s1, 2048, %s20_s19, [#allocation3], %s402_s21, %s402_s21, %s403_s22  }
   0xd   :  { %s404_s25 = smov [#allocation4]  }
   0xe   :  { %s33_s26 = sshll.u32 %s404_s25, 4  ;;  %s34_s26 = int_to_ptr.vmem [resolvable:$true] %s33_s26 }
   0xf   :  { %s385_s27 = scalar_lea.vmem %s34_s26, 2048  ;;  %p390_p6 = scmp.lt.s32.totalorder %s34_s26, %s34_s26 }
  0x10   :  { %p386_p5 = scmp.ne.s32.totalorder %s34_s26, %s385_s27  ;;  %p391_p7 = scmp.lt.s32.totalorder %s385_s27, %s385_s27 }
  0x12   :  { %p392_p8 = por %p391_p7, %p390_p6 }
  0x14   :  { %p393_p9 = pnand %p392_p8, %p386_p5 }
  0x16   :  { %396 = shalt.err (!%p393_p9)
}
  0x17   :  { %39 = dma.hbm_to_vmem [thread:$0]  %s492_s3, 2048, %s34_s26, [#allocation5], %s402_s21, %s402_s21, %s403_s22  }
  0x18   :  { %397 = dma.done.wait [#allocation3], 2048  }
  0x19   :  { %398 = vsyncadd [#allocation3], 4294965248 }
  0x1a   :  { %399 = dma.done.wait [#allocation5], 2048  }
  0x1b   :  { %400 = vsyncadd [#allocation5], 4294965248  ;;  %v405_v0 = vmov 0.0   ;;  %vm406_vm0 = vmmov 0   ;;  %v64_v1 = vld [vmem:[#allocation2 + $0x78] sm:$0xff]  ;;  %v63_v2 = vld [vmem:[#allocation2 + $0x70] sm:$0xff] }
  0x1c   :  { %279 = vmatprep.subr.mxu0 %v405_v0  ;;  %311 = vmatprep.mubr.msk.f32.mxu0 %vm406_vm0, %v405_v0  ;;  %v62_v3 = vld [vmem:[#allocation2 + $0x68] sm:$0xff]  ;;  %v61_v4 = vld [vmem:[#allocation2 + $0x60] sm:$0xff]  ;;  %v158_v5 = vld [vmem:[#allocation4 + $0x78] sm:$0xff] }
  0x1d   :  { %314 = vmatprep.subr.mxu1 %v405_v0  ;;  %346 = vmatprep.mubr.msk.f32.mxu1 %vm406_vm0, %v405_v0  ;;  %v60_v6 = vld [vmem:[#allocation2 + $0x58] sm:$0xff]  ;;  %v157_v7 = vld [vmem:[#allocation4 + $0x70] sm:$0xff]  ;;  %v156_v8 = vld [vmem:[#allocation4 + $0x68] sm:$0xff] }
  0x1e   :  { %280 = vmatpush3.msra.mxu0 %v64_v1  ;;  %315 = vmatpush3.msra.mxu1 %v158_v5  ;;  %v59_v9 = vld [vmem:[#allocation2 + $0x50] sm:$0xff]  ;;  %v155_v10 = vld [vmem:[#allocation4 + $0x60] sm:$0xff]  ;;  %v58_v11 = vld [vmem:[#allocation2 + $0x48] sm:$0xff] }
  0x1f   :  { %281 = vmatprep.subr.mxu0 %v405_v0  ;;  %316 = vmatprep.subr.mxu1 %v405_v0  ;;  %v154_v12 = vld [vmem:[#allocation4 + $0x58] sm:$0xff]  ;;  %v57_v13 = vld [vmem:[#allocation2 + $0x40] sm:$0xff]  ;;  %v153_v14 = vld [vmem:[#allocation4 + $0x50] sm:$0xff] }
  0x20   :  { %282 = vmatpush3.msra.mxu0 %v63_v2  ;;  %317 = vmatpush3.msra.mxu1 %v157_v7  ;;  %v56_v15 = vld [vmem:[#allocation2 + $0x38] sm:$0xff]  ;;  %v152_v16 = vld [vmem:[#allocation4 + $0x48] sm:$0xff]  ;;  %v55_v17 = vld [vmem:[#allocation2 + $0x30] sm:$0xff] }
  0x21   :  { %283 = vmatprep.subr.mxu0 %v405_v0  ;;  %318 = vmatprep.subr.mxu1 %v405_v0  ;;  %v54_v18 = vld [vmem:[#allocation2 + $0x28] sm:$0xff]  ;;  %v53_v19 = vld [vmem:[#allocation2 + $0x20] sm:$0xff]  ;;  %v52_v20 = vld [vmem:[#allocation2 + $0x18] sm:$0xff] }
  0x22   :  { %284 = vmatpush3.msra.mxu0 %v62_v3  ;;  %319 = vmatpush3.msra.mxu1 %v156_v8  ;;  %v51_v21 = vld [vmem:[#allocation2 + $0x10] sm:$0xff]  ;;  %v50_v22 = vld [vmem:[#allocation2 + $0x8] sm:$0xff]  ;;  %v49_v23 = vld [vmem:[#allocation2] sm:$0xff] }
  0x23   :  { %285 = vmatprep.subr.mxu0 %v405_v0  ;;  %320 = vmatprep.subr.mxu1 %v405_v0  ;;  %v48_v24 = vld [vmem:[%s489_s0] sm:$0xff]  ;;  %v150_v26 = vld [vmem:[#allocation4 + $0x38] sm:$0xff]  ;;  %v149_v27 = vld [vmem:[#allocation4 + $0x30] sm:$0xff] }
  0x24   :  { %286 = vmatpush3.msra.mxu0 %v61_v4  ;;  %321 = vmatpush3.msra.mxu1 %v155_v10  ;;  %v151_v25 = vld [vmem:[#allocation4 + $0x40] sm:$0xff]  ;;  %v148_v28 = vld [vmem:[#allocation4 + $0x28] sm:$0xff]  ;;  %v146_v30 = vld [vmem:[#allocation4 + $0x18] sm:$0xff] }
  0x25   :  { %287 = vmatprep.subr.mxu0 %v405_v0  ;;  %322 = vmatprep.subr.mxu1 %v405_v0  ;;  %v147_v29 = vld [vmem:[#allocation4 + $0x20] sm:$0xff]  ;;  %v145_v31 = vld [vmem:[#allocation4 + $0x10] sm:$0xff]  ;;  %v144_v32 = vld [vmem:[#allocation4 + $0x8] sm:$0xff] }
  0x26   :  { %288 = vmatpush3.msra.mxu0 %v60_v6  ;;  %323 = vmatpush3.msra.mxu1 %v154_v12  ;;  %v143_v33 = vld [vmem:[#allocation4] sm:$0xff] }
  0x27   :  { %289 = vmatprep.subr.mxu0 %v405_v0  ;;  %324 = vmatprep.subr.mxu1 %v405_v0  ;;  %v243_v34 = vld [vmem:[%s491_s2] ss:$0 sm:$0xff] }
  0x28   :  { %290 = vmatpush3.msra.mxu0 %v59_v9  ;;  %325 = vmatpush3.msra.mxu1 %v153_v14  ;;  %v244_v39 = vld [vmem:[%s493_s4] ss:$0 sm:$0xff] }
  0x29   :  { %291 = vmatprep.subr.mxu0 %v405_v0  ;;  %326 = vmatprep.subr.mxu1 %v405_v0 }
  0x2a   :  { %292 = vmatpush3.msra.mxu0 %v58_v11  ;;  %327 = vmatpush3.msra.mxu1 %v152_v16 }
  0x2b   :  { %293 = vmatprep.subr.mxu0 %v405_v0  ;;  %328 = vmatprep.subr.mxu1 %v405_v0 }
  0x2c   :  { %294 = vmatpush3.msra.mxu0 %v57_v13  ;;  %329 = vmatpush3.msra.mxu1 %v151_v25 }
  0x2d   :  { %295 = vmatprep.subr.mxu0 %v405_v0  ;;  %330 = vmatprep.subr.mxu1 %v405_v0 }
  0x2e   :  { %296 = vmatpush3.msra.mxu0 %v56_v15  ;;  %331 = vmatpush3.msra.mxu1 %v150_v26 }
  0x2f   :  { %297 = vmatprep.subr.mxu0 %v405_v0  ;;  %332 = vmatprep.subr.mxu1 %v405_v0 }
  0x30   :  { %298 = vmatpush3.msra.mxu0 %v55_v17  ;;  %333 = vmatpush3.msra.mxu1 %v149_v27 }
  0x31   :  { %299 = vmatprep.subr.mxu0 %v405_v0  ;;  %334 = vmatprep.subr.mxu1 %v405_v0 }
  0x32   :  { %300 = vmatpush3.msra.mxu0 %v54_v18  ;;  %335 = vmatpush3.msra.mxu1 %v148_v28 }
  0x33   :  { %301 = vmatprep.subr.mxu0 %v405_v0  ;;  %336 = vmatprep.subr.mxu1 %v405_v0 }
  0x34   :  { %302 = vmatpush3.msra.mxu0 %v53_v19  ;;  %337 = vmatpush3.msra.mxu1 %v147_v29 }
  0x35   :  { %303 = vmatprep.subr.mxu0 %v405_v0  ;;  %338 = vmatprep.subr.mxu1 %v405_v0 }
  0x36   :  { %304 = vmatpush3.msra.mxu0 %v52_v20  ;;  %339 = vmatpush3.msra.mxu1 %v146_v30 }
  0x37   :  { %305 = vmatprep.subr.mxu0 %v405_v0  ;;  %340 = vmatprep.subr.mxu1 %v405_v0 }
  0x38   :  { %306 = vmatpush3.msra.mxu0 %v51_v21  ;;  %341 = vmatpush3.msra.mxu1 %v145_v31 }
  0x39   :  { %307 = vmatprep.subr.mxu0 %v405_v0  ;;  %342 = vmatprep.subr.mxu1 %v405_v0 }
  0x3a   :  { %308 = vmatpush3.msra.mxu0 %v50_v22  ;;  %343 = vmatpush3.msra.mxu1 %v144_v32 }
  0x3b   :  { %309 = vmatprep.subr.mxu0 %v405_v0  ;;  %344 = vmatprep.subr.mxu1 %v405_v0 }
  0x3c   :  { %310 = vmatpush3.msra.mxu0 %v49_v23  ;;  %345 = vmatpush3.msra.mxu1 %v143_v33 }
  0x3d   :  { %312 = vmatmul.mubr.f32.vlgmr.msra.gmra.mxu0 %v48_v24 }
  0xfd   :  { %v138_v35 = vpop.f32.mrf.mxu0 }
  0xfe   :  { %v139_v36 = vadd.f32 %v243_v34, %v138_v35 }
  0xff   :  { %v313_v37 = vpop.f32.mrf.mxu0 }
 0x100   :  { %355 = vtanh.f32 %v139_v36 }
 0x10d   :  { %v356_v38 = vpop.eup %355 }
 0x10e   :  { %347 = vmatmul.mubr.f32.vlgmr.msra.gmra.mxu1 %v356_v38 }
 0x1ce   :  { %v232_v40 = vpop.f32.mrf.mxu1 }
 0x1cf   :  { %v233_v41 = vadd.f32 %v244_v39, %v232_v40 }
 0x1d0   :  { %v348_v42 = vpop.f32.mrf.mxu1 }
 0x1d1   :  { %236 = vst [vmem:[%s494_s5] sm:$0xff] %v233_v41 }
 0x1d2   :  { %241 = vsyncpa [#allocation3], 1 }
 0x1d3   :  { %242 = vsyncpa [#allocation5], 1 }

</bundles_post_ra>
